<compile_context>
chip_gen: v7x
topology: tpu7x:2x2x1
jax: 0.10.0
libtpu: 0.0.40
codegen_flags: <defaults>
</compile_context>

<pallas_src>
import jax
import jax.numpy as jnp
from jax.experimental import pallas as pl
from jax.experimental.pallas import tpu as pltpu

# --- synthetic problem sizes (element_set / feature_calculators are external
#     in the original repo; deterministic stand-ins) ---
NUM_FEATURES = 24      # len(feature_calculators.feature_labels())
MAX_STEP_SIZE = 5
NUM_ELEM = 16          # len(element_set)
NUM_COMP = 10
INTERMEDIATE_DIM = 64
BATCH = 8

K_TOTAL = NUM_FEATURES + MAX_STEP_SIZE + NUM_ELEM + NUM_COMP   # 55
K_PAD = 64                                                     # padded feature dim
BIAS_ROW = K_TOTAL                                             # constant-1 row of x^T
D = INTERMEDIATE_DIM                                           # 64
D4 = 4 * INTERMEDIATE_DIM                                      # 256

LANE = 128
MAX_BATCH_TILE = 4096          # batch tile on the lane axis (multiple of 128)
SMALL_BATCH_FALLBACK = 256     # below this, kernel-launch cost beats the win

LEAKY_SLOPE = 0.01             # nn.LeakyReLU default


def _leaky_relu(x):
    # max(x, a*x) == LeakyReLU(x) for 0 < a < 1: one VPU op cheaper than where().
    return jnp.maximum(x, LEAKY_SLOPE * x)


def dcn_kernel(x_ref, w_in_ref, w5_ref, tail_ref, out_ref):
    """Fused DCN forward for one batch tile, feature-major (batch on lanes).

    x_ref    : (64, TB)  bf16  inputs^T: rows 0:55 = [s_material|s_step|a_elem|
               a_comp]^T, row 55 = 1.0 (bias trick), rows 56:63 = 0.
    w_in_ref : (256, 64) bf16  block-diagonal [w1|w2|w3|w4]^T; column 55 carries
               [b1|b2|b3|b4].
    w5_ref   : (64, 256) bf16  fc5 weight transposed (out, in).
    tail_ref : (64, 8)   f32   col 0 = b5, col 1 = w6, col 2 = b6 (broadcast).
    out_ref  : (1, TB)   f32   sigmoid(fc6(...)) as a lane-dense row.
    """
    # Stage 1: fc1..fc4 + bias + concat as ONE block-diagonal matmul (MXU, bf16).
    h_cat = _leaky_relu(
        jnp.dot(w_in_ref[...], x_ref[...], preferred_element_type=jnp.float32))

    # Stage 2: fc5 (bf16 operands, f32 accumulate) + bias + LeakyReLU.
    h = _leaky_relu(
        jnp.dot(w5_ref[...], h_cat.astype(jnp.bfloat16),
                preferred_element_type=jnp.float32)
        + tail_ref[:, 0:1])

    # Stage 3: fc6 as a VPU multiply + sublane reduction (no 1-wide MXU pass);
    # the result is naturally lane-dense with shape (1, TB).
    en = jnp.sum(h * tail_ref[:, 1:2], axis=0, keepdims=True) + tail_ref[0:1, 2:3]

    # Sigmoid: exp on the EUP + approximate reciprocal on the EUP.
    out_ref[...] = pl.reciprocal(1.0 + jnp.exp(-en), approx=True)


def pack_params(params):
    """Pack the 12 (weight, bias) tensors into 3 arrays (bf16 MXU operands)."""
    (w1, b1, w2, b2, w3, b3, w4, b4, w5, b5, w6, b6) = params

    o1 = 0
    o2 = o1 + NUM_FEATURES
    o3 = o2 + MAX_STEP_SIZE
    o4 = o3 + NUM_ELEM

    w_in = jnp.zeros((D4, K_PAD), jnp.float32)
    w_in = w_in.at[0 * D:1 * D, o1:o1 + NUM_FEATURES].set(w1.T)
    w_in = w_in.at[1 * D:2 * D, o2:o2 + MAX_STEP_SIZE].set(w2.T)
    w_in = w_in.at[2 * D:3 * D, o3:o3 + NUM_ELEM].set(w3.T)
    w_in = w_in.at[3 * D:4 * D, o4:o4 + NUM_COMP].set(w4.T)
    # bias column (paired with the constant-1 row of the packed input)
    w_in = w_in.at[:, BIAS_ROW].set(
        jnp.concatenate([b1[0], b2[0], b3[0], b4[0]]))

    tail = jnp.zeros((D, 8), jnp.float32)
    tail = tail.at[:, 0].set(b5[0])        # fc5 bias
    tail = tail.at[:, 1].set(w6[:, 0])     # fc6 weight as a column
    tail = tail.at[:, 2].set(b6[0, 0])     # fc6 bias (only [0, 2] is read)

    return (w_in.astype(jnp.bfloat16), w5.T.astype(jnp.bfloat16), tail)


def _pack_inputs_T(s_material, s_step, a_elem, a_comp, bp):
    """(B, 55) inputs -> (64, bp) bf16 feature-major operand with a ones row."""
    B = s_material.shape[0]
    x = jnp.concatenate(
        [s_material.astype(jnp.float32), s_step.astype(jnp.float32),
         a_elem.astype(jnp.float32), a_comp.astype(jnp.float32),
         jnp.ones((B, 1), jnp.float32)], axis=1)              # (B, 56)
    x = jnp.pad(x, ((0, bp - B), (0, K_PAD - x.shape[1])))    # (bp, 64)
    # TODO(synk): fold this transpose/pack into the kernel (needs an in-kernel
    # (tb, 64)->(64, tb) relayout); for now it is one fused XLA pass.
    return x.T.astype(jnp.bfloat16)                           # (64, bp)


def _round_up(x, m):
    return ((x + m - 1) // m) * m


def _choose_batch_tile(batch):
    bp = _round_up(max(batch, 1), LANE)
    if bp <= 2 * LANE:
        return bp                                  # too small to split
    # >= 2 grid steps so both TensorCores get work on v7x; tile capped at MAX.
    n_tiles = max(2, pl.cdiv(bp, MAX_BATCH_TILE))
    return _round_up(pl.cdiv(bp, n_tiles), LANE)


@jax.jit
def dcn_forward_pallas(s_material, s_step, a_elem, a_comp, packed_params):
    w_in, w5t, tail = packed_params
    B = s_material.shape[0]

    tb = _choose_batch_tile(B)
    bp = pl.cdiv(B, tb) * tb
    x = _pack_inputs_T(s_material, s_step, a_elem, a_comp, bp)

    weight_bytes = w_in.size * 2 + w5t.size * 2 + tail.size * 4
    cost = pl.CostEstimate(
        flops=2 * bp * (K_PAD * D4 + D4 * D + D),
        transcendentals=2 * bp,
        bytes_accessed=bp * K_PAD * 2 + bp * 4 + weight_bytes)

    out = pl.pallas_call(
        dcn_kernel,
        out_shape=jax.ShapeDtypeStruct((1, bp), jnp.float32),
        grid=(bp // tb,),
        in_specs=[
            pl.BlockSpec((K_PAD, tb), lambda i: (0, i)),     # packed inputs^T
            # Constant-index weight operands (index_map (0,0)) — DMAs are deduped
            # across grid steps; pl.Buffered(1) would trim one spare buffer but
            # is skipped to keep lowering maximally portable across generations.
            pl.BlockSpec((D4, K_PAD), lambda i: (0, 0)),     # w_in^T
            pl.BlockSpec((D, D4), lambda i: (0, 0)),         # w5^T
            pl.BlockSpec((D, 8), lambda i: (0, 0)),          # b5 | w6 | b6
        ],
        out_specs=pl.BlockSpec((1, tb), lambda i: (0, i)),   # lane-dense row
        compiler_params=pltpu.CompilerParams(
            dimension_semantics=("parallel",),
            vmem_limit_bytes=48 * 1024 * 1024),
        cost_estimate=cost,
    )(x, w_in, w5t, tail)

    return out[0, :B][:, None]


@jax.jit
def reference_forward(s_material, s_step, a_elem, a_comp, params):
    """Pure-JAX reference mirroring the PyTorch forward (f32)."""
    (w1, b1, w2, b2, w3, b3, w4, b4, w5, b5, w6, b6) = params
    h1 = _leaky_relu(s_material @ w1 + b1)
    h2 = _leaky_relu(s_step.astype(jnp.float32) @ w2 + b2)
    h3 = _leaky_relu(a_elem.astype(jnp.float32) @ w3 + b3)
    h4 = _leaky_relu(a_comp.astype(jnp.float32) @ w4 + b4)
    h = jnp.concatenate([h1, h2, h3, h4], axis=1)
    h = _leaky_relu(h @ w5 + b5)
    return jax.nn.sigmoid(h @ w6 + b6)


def dcn_forward(s_material, s_step, a_elem, a_comp, params, packed_params=None,
                min_pallas_batch=SMALL_BATCH_FALLBACK):
    """Dispatcher: tiny batches -> pure-JAX (kernel launch not worth it)."""
    if s_material.shape[0] < min_pallas_batch:
        return reference_forward(s_material, s_step, a_elem, a_comp, params)
    if packed_params is None:
        packed_params = pack_params(params)
    return dcn_forward_pallas(s_material, s_step, a_elem, a_comp, packed_params)


def _linear_params(key, fan_in, fan_out):
    """PyTorch nn.Linear default init, weight stored as (fan_in, fan_out)."""
    kw, kb = jax.random.split(key)
    bound = 1.0 / jnp.sqrt(jnp.float32(fan_in))
    w = jax.random.uniform(kw, (fan_in, fan_out), jnp.float32, -bound, bound)
    b = jax.random.uniform(kb, (1, fan_out), jnp.float32, -bound, bound)
    return w, b


def init_params(key):
    keys = jax.random.split(key, 6)
    w1, b1 = _linear_params(keys[0], NUM_FEATURES, INTERMEDIATE_DIM)
    w2, b2 = _linear_params(keys[1], MAX_STEP_SIZE, INTERMEDIATE_DIM)
    w3, b3 = _linear_params(keys[2], NUM_ELEM, INTERMEDIATE_DIM)
    w4, b4 = _linear_params(keys[3], NUM_COMP, INTERMEDIATE_DIM)
    w5, b5 = _linear_params(keys[4], 4 * INTERMEDIATE_DIM, INTERMEDIATE_DIM)
    w6, b6 = _linear_params(keys[5], INTERMEDIATE_DIM, 1)
    return (w1, b1, w2, b2, w3, b3, w4, b4, w5, b5, w6, b6)


def _make_inputs(key, batch):
    k1, k2, k3, k4 = jax.random.split(key, 4)
    return (jax.random.normal(k1, (batch, NUM_FEATURES), jnp.float32),
            jax.random.normal(k2, (batch, MAX_STEP_SIZE), jnp.float32),
            jax.random.normal(k3, (batch, NUM_ELEM), jnp.float32),
            jax.random.normal(k4, (batch, NUM_COMP), jnp.float32))


if __name__ == "__main__":
    key = jax.random.PRNGKey(0)
    k_small, k_big, k_p = jax.random.split(key, 3)

    params = init_params(k_p)
    packed = pack_params(params)

    # bf16 MXU operands + EUP approx reciprocal -> relaxed tolerance.
    ATOL, RTOL = 2e-2, 2e-2

    # 1) Small batch, kernel path exercised directly (single grid step + padding).
    inp_s = _make_inputs(k_small, BATCH)
    out_s = jax.block_until_ready(dcn_forward_pallas(*inp_s, packed))
    ref_s = reference_forward(*inp_s, params)
    assert out_s.shape == (BATCH, 1), out_s.shape
    assert jnp.allclose(out_s, ref_s, atol=ATOL, rtol=RTOL), (
        "max abs err", float(jnp.max(jnp.abs(out_s - ref_s))))

    # 2) Larger batch through the dispatcher: multi-tile grid, batch padding,
    #    megacore-friendly tiling (300 -> 2 tiles of 256).
    B2 = 300
    inp_b = _make_inputs(k_big, B2)
    out_b = jax.block_until_ready(dcn_forward(*inp_b, params, packed))
    ref_b = reference_forward(*inp_b, params)
    assert out_b.shape == (B2, 1), out_b.shape
    assert jnp.allclose(out_b, ref_b, atol=ATOL, rtol=RTOL), (
        "max abs err", float(jnp.max(jnp.abs(out_b - ref_b))))

    print("KERNEL_OK")
</pallas_src>

<mosaic_0001>
module attributes {stable_mosaic.version = 11 : i64} {
  func.func @dcn_kernel(%arg0: i32, %arg1: memref<64x128xbf16, #tpu.memory_space<vmem>>, %arg2: memref<256x64xbf16, #tpu.memory_space<vmem>>, %arg3: memref<64x256xbf16, #tpu.memory_space<vmem>>, %arg4: memref<64x8xf32, #tpu.memory_space<vmem>>, %arg5: memref<1x128xf32, #tpu.memory_space<vmem>>) attributes {dimension_semantics = [#tpu.dimension_semantics<parallel>], iteration_bounds = array<i64: 1>, scalar_prefetch = 0 : i64, scratch_operands = 0 : i64, tpu.core_type = #tpu.core_type<tc>, window_params = [{transform_indices = @transform_0, window_bounds = array<i64: 64, 128>}, {pipeline_mode = #tpu.pipeline_mode<synchronous>, transform_indices = @transform_1, window_bounds = array<i64: 256, 64>}, {pipeline_mode = #tpu.pipeline_mode<synchronous>, transform_indices = @transform_2, window_bounds = array<i64: 64, 256>}, {pipeline_mode = #tpu.pipeline_mode<synchronous>, transform_indices = @transform_3, window_bounds = array<i64: 64, 8>}, {transform_indices = @transform_4, window_bounds = array<i64: 1, 128>}]} {
    %c0 = arith.constant 0 : index
    %c0_0 = arith.constant 0 : index
    %0 = vector.load %arg2[%c0, %c0_0] : memref<256x64xbf16, #tpu.memory_space<vmem>>, vector<256x64xbf16>
    %c0_1 = arith.constant 0 : index
    %c0_2 = arith.constant 0 : index
    %1 = vector.load %arg1[%c0_1, %c0_2] : memref<64x128xbf16, #tpu.memory_space<vmem>>, vector<64x128xbf16>
    %cst = arith.constant dense<0.000000e+00> : vector<256x128xf32>
    %2 = tpu.matmul %0, %1, %cst {dimension_numbers = #tpu.dot_dimension_numbers<[1], [0], [0], [1], [0, 0, 1, 1], [], []>} : vector<256x64xbf16>, vector<64x128xbf16>, vector<256x128xf32> -> vector<256x128xf32>
    %cst_3 = arith.constant 0.00999999977 : f32
    %3 = vector.broadcast %cst_3 : f32 to vector<256x128xf32>
    %4 = arith.mulf %3, %2 : vector<256x128xf32>
    %5 = arith.maximumf %2, %4 : vector<256x128xf32>
    %c0_4 = arith.constant 0 : index
    %c0_5 = arith.constant 0 : index
    %6 = vector.load %arg3[%c0_4, %c0_5] : memref<64x256xbf16, #tpu.memory_space<vmem>>, vector<64x256xbf16>
    %7 = arith.truncf %5 : vector<256x128xf32> to vector<256x128xbf16>
    %cst_6 = arith.constant dense<0.000000e+00> : vector<64x128xf32>
    %8 = tpu.matmul %6, %7, %cst_6 {dimension_numbers = #tpu.dot_dimension_numbers<[1], [0], [0], [1], [0, 0, 1, 1], [], []>} : vector<64x256xbf16>, vector<256x128xbf16>, vector<64x128xf32> -> vector<64x128xf32>
    %c0_7 = arith.constant 0 : index
    %c0_8 = arith.constant 0 : index
    %9 = vector.load %arg4[%c0_7, %c0_8] : memref<64x8xf32, #tpu.memory_space<vmem>>, vector<64x1xf32>
    %10 = vector.broadcast %9 : vector<64x1xf32> to vector<64x128xf32>
    %11 = arith.addf %8, %10 : vector<64x128xf32>
    %cst_9 = arith.constant 0.00999999977 : f32
    %12 = vector.broadcast %cst_9 : f32 to vector<64x128xf32>
    %13 = arith.mulf %12, %11 : vector<64x128xf32>
    %14 = arith.maximumf %11, %13 : vector<64x128xf32>
    %c0_10 = arith.constant 0 : index
    %c1 = arith.constant 1 : index
    %15 = vector.load %arg4[%c0_10, %c1] : memref<64x8xf32, #tpu.memory_space<vmem>>, vector<64x1xf32>
    %16 = vector.broadcast %15 : vector<64x1xf32> to vector<64x128xf32>
    %17 = arith.mulf %14, %16 : vector<64x128xf32>
    %cst_11 = arith.constant dense<0.000000e+00> : vector<128xf32>
    %18 = vector.multi_reduction <add>, %17, %cst_11 [0] : vector<64x128xf32> to vector<128xf32>
    %19 = vector.shape_cast %18 : vector<128xf32> to vector<1x128xf32>
    %c0_12 = arith.constant 0 : index
    %c2 = arith.constant 2 : index
    %20 = vector.load %arg4[%c0_12, %c2] : memref<64x8xf32, #tpu.memory_space<vmem>>, vector<1x1xf32>
    %21 = vector.broadcast %20 : vector<1x1xf32> to vector<1x128xf32>
    %22 = arith.addf %19, %21 : vector<1x128xf32>
    %cst_13 = arith.constant 0.000000e+00 : f32
    %23 = vector.broadcast %cst_13 : f32 to vector<1x128xf32>
    %24 = arith.subf %23, %22 : vector<1x128xf32>
    %25 = math.exp %24 : vector<1x128xf32>
    %cst_14 = arith.constant 1.000000e+00 : f32
    %26 = vector.broadcast %cst_14 : f32 to vector<1x128xf32>
    %27 = arith.addf %26, %25 : vector<1x128xf32>
    %28 = tpu.reciprocal %27 {approx = true} : vector<1x128xf32> -> vector<1x128xf32>
    %c0_15 = arith.constant 0 : index
    %c0_16 = arith.constant 0 : index
    %29 = vector.load %arg5[%c0_15, %c0_16] : memref<1x128xf32, #tpu.memory_space<vmem>>, vector<1x128xf32>
    tpu.vector_store %arg5[%c0_15, %c0_16], %28 {strides = array<i32>} : memref<1x128xf32, #tpu.memory_space<vmem>>, vector<1x128xf32>,
    return
  }
  func.func @transform_0(%arg0: i32) -> (i32, i32) {
    %c0_i32 = arith.constant 0 : i32
    %c0_i32_0 = arith.constant 0 : i32
    return %c0_i32, %arg0 : i32, i32
  }
  func.func @transform_1(%arg0: i32) -> (i32, i32) {
    %c0_i32 = arith.constant 0 : i32
    %c0_i32_0 = arith.constant 0 : i32
    %c0_i32_1 = arith.constant 0 : i32
    return %c0_i32, %c0_i32_0 : i32, i32
  }
  func.func @transform_2(%arg0: i32) -> (i32, i32) {
    %c0_i32 = arith.constant 0 : i32
    %c0_i32_0 = arith.constant 0 : i32
    %c0_i32_1 = arith.constant 0 : i32
    return %c0_i32, %c0_i32_0 : i32, i32
  }
  func.func @transform_3(%arg0: i32) -> (i32, i32) {
    %c0_i32 = arith.constant 0 : i32
    %c0_i32_0 = arith.constant 0 : i32
    %c0_i32_1 = arith.constant 0 : i32
    return %c0_i32, %c0_i32_0 : i32, i32
  }
  func.func @transform_4(%arg0: i32) -> (i32, i32) {
    %c0_i32 = arith.constant 0 : i32
    %c0_i32_0 = arith.constant 0 : i32
    return %c0_i32, %arg0 : i32, i32
  }
}

</mosaic_0001>

<bundles_post_ra>
// kernel: dcn_forward_pallas.1
= control target key start
LH: loop header
LB: loop body
LE: loop exit
PB: predicated region body
PF: predicated region fallthrough
CT: control target
= control target key end

     0   :  { %vm162_vm0 = vcmask 523264   ;;  %v893_v21 = vmov 0   ;;  %v894_v23 = vmov 1   ;;  %v895_v36 = vmov 2   ;;  %s1075_s0 = inlined_call_operand.vmem [shape: bf16[64,128], index: 0, kind: input, shape index: {}]   ;;  %s1076_s1 = inlined_call_operand.vmem [shape: bf16[256,64], index: 1, kind: input, shape index: {}]   ;;  %s1077_s2 = inlined_call_operand.vmem [shape: bf16[64,256], index: 2, kind: input, shape index: {}]   ;;  %s1078_s3 = inlined_call_operand.vmem [shape: f32[64,8], index: 3, kind: input, shape index: {}]   ;;  %s1079_s4 = inlined_call_operand.vmem [shape: f32[1,128], index: 4, kind: output, shape index: {}]  }
   0x1   :  { %v857_v0 = vld [vmem:[%s1075_s0] sm:$0xff]   ;;  %v858_v1 = vld [vmem:[%s1075_s0 + $0x8] sm:$0xff]   ;;  %v859_v2 = vld [vmem:[%s1075_s0 + $0x10] sm:$0xff]   ;;  %846 = vset.pattern.permute.xlu1 %v893_v21  ;;  %848 = vset.pattern.permute.xlu0 %v894_v23 }
   0x2   :  { %803 = vmatprep.subr.bf16.mxu0 %v857_v0  ;;  %v861_v3 = vld [vmem:[%s1076_s1] sm:$0xff]   ;;  %v860_v4 = vld [vmem:[%s1075_s0 + $0x18] sm:$0xff]   ;;  %v862_v5 = vld [vmem:[%s1076_s1 + $0x8] sm:$0xff]  }
   0x3   :  { %804 = vmatpush3.bf16.msra.mxu0 %v857_v0  ;;  %811 = vmatprep.mubr.msk.bf16.mxu0 %vm162_vm0, %v861_v3  ;;  %v863_v6 = vld [vmem:[%s1076_s1 + $0x10] sm:$0xff]   ;;  %v864_v7 = vld [vmem:[%s1076_s1 + $0x18] sm:$0xff]   ;;  %v865_v8 = vld [vmem:[%s1076_s1 + $0x20] sm:$0xff]  }
   0x4   :  { %805 = vmatprep.subr.bf16.mxu0 %v858_v1  ;;  %v866_v9 = vld [vmem:[%s1076_s1 + $0x28] sm:$0xff]   ;;  %v867_v10 = vld [vmem:[%s1076_s1 + $0x30] sm:$0xff]   ;;  %v868_v11 = vld [vmem:[%s1076_s1 + $0x38] sm:$0xff]  }
   0x5   :  { %v869_v12 = vld [vmem:[%s1076_s1 + $0x40] sm:$0xff]   ;;  %v870_v13 = vld [vmem:[%s1076_s1 + $0x48] sm:$0xff]   ;;  %v871_v14 = vld [vmem:[%s1076_s1 + $0x50] sm:$0xff]  }
   0x6   :  { %v872_v15 = vld [vmem:[%s1076_s1 + $0x58] sm:$0xff]   ;;  %v873_v16 = vld [vmem:[%s1076_s1 + $0x60] sm:$0xff]   ;;  %v874_v17 = vld [vmem:[%s1076_s1 + $0x68] sm:$0xff]  }
   0x7   :  { %806 = vmatpush3.bf16.msra.mxu0 %v858_v1  ;;  %v875_v18 = vld [vmem:[%s1076_s1 + $0x70] sm:$0xff]   ;;  %v876_v19 = vld [vmem:[%s1076_s1 + $0x78] sm:$0xff]   ;;  %v879_v20 = vld [vmem:[%s1077_s2 + $0x4] ss:$8 sps:$4 sm:$0xff]  }
   0x8   :  { %807 = vmatprep.subr.bf16.mxu0 %v859_v2  ;;  %580 = vmatprep.mubr.bf16.mxu1 %v879_v20  ;;  %v462_v22 = vld [vmem:[%s1078_s3 + $0x10] sm:$0xff]  ;;  %v461_v24 = vld [vmem:[%s1078_s3 + $0x8] sm:$0xff]  ;;  %v463_v25 = vld [vmem:[%s1078_s3 + $0x18] sm:$0xff] }
   0x9   :  { %480 = vperm.xlu1 %846, %v462_v22   ;;  %634 = vperm.xlu0 %848, %v461_v24   ;;  %v460_v26 = vld [vmem:[%s1078_s3] sm:$0xff]  ;;  %v465_v28 = vld [vmem:[%s1078_s3 + $0x28] sm:$0xff]  ;;  %v466_v29 = vld [vmem:[%s1078_s3 + $0x30] sm:$0xff] }
   0xa   :  { %v464_v27 = vld [vmem:[%s1078_s3 + $0x20] sm:$0xff]  ;;  %v467_v30 = vld [vmem:[%s1078_s3 + $0x38] sm:$0xff] }
   0xb   :  { %808 = vmatpush3.bf16.msra.mxu0 %v859_v2  ;;  %v682_v53 = vld [vmem:[%s1078_s3] sm:$0x1] }
   0xc   :  { %809 = vmatprep.subr.bf16.mxu0 %v860_v4 }
   0xd   :  { %485 = vperm.xlu1 %846, %v463_v25   ;;  %849 = vset.pattern.permute.xlu0 %v893_v21 }
   0xe   :  { %470 = vperm.xlu0 %849, %v460_v26  }
   0xf   :  { %810 = vmatpush3.bf16.msra.mxu0 %v860_v4 }
  0x11   :  { %847 = vset.pattern.permute.xlu1 %v894_v23 }
  0x12   :  { %812 = vmatmul.mubr.msk.bf16.vlgmr.msra.gmra.mrb[0].mxu0 %vm162_vm0, %v862_v5  ;;  %630 = vperm.xlu1 %847, %v460_v26  }
  0x13   :  { %815 = vmatprep.mubr.msk.bf16.mxu0 %vm162_vm0, %v863_v6  ;;  %475 = vperm.xlu0 %849, %v461_v24  }
  0x16   :  { %850 = vset.pattern.permute.xlu1 %v893_v21 }
  0x17   :  { %490 = vperm.xlu0 %849, %v464_v27   ;;  %495 = vperm.xlu1 %850, %v465_v28  }
  0x1a   :  { %816 = vmatmul.mubr.msk.bf16.gmra.mrb[4].mxu0 %vm162_vm0, %v864_v7 }
  0x1b   :  { %819 = vmatprep.mubr.msk.bf16.mxu0 %vm162_vm0, %v865_v8  ;;  %500 = vperm.xlu0 %849, %v466_v29  }
  0x1c   :  { %851 = vset.pattern.permute.xlu1 %v894_v23 }
  0x1d   :  { %638 = vperm.xlu1 %851, %v462_v22  }
  0x1f   :  { %853 = vset.pattern.permute.xlu0 %v894_v23 }
  0x20   :  { %646 = vperm.xlu0 %853, %v464_v27  }
  0x21   :  { %642 = vperm.xlu1 %851, %v463_v25  }
  0x22   :  { %820 = vmatmul.mubr.msk.bf16.gmra.mrb[8].mxu0 %vm162_vm0, %v866_v9 }
  0x23   :  { %823 = vmatprep.mubr.msk.bf16.mxu0 %vm162_vm0, %v867_v10 }
  0x24   :  { %658 = vperm.xlu0 %853, %v467_v30  }
  0x25   :  { %852 = vset.pattern.permute.xlu1 %v893_v21 }
  0x26   :  { %505 = vperm.xlu1 %852, %v467_v30  }
  0x28   :  { %856 = vset.pattern.permute.xlu0 %v895_v36 }
  0x2a   :  { %824 = vmatmul.mubr.msk.bf16.gmra.mrb[12].mxu0 %vm162_vm0, %v868_v11  ;;  %854 = vset.pattern.permute.xlu1 %v894_v23 }
  0x2b   :  { %827 = vmatprep.mubr.msk.bf16.mxu0 %vm162_vm0, %v869_v12  ;;  %650 = vperm.xlu1 %854, %v465_v28  }
  0x2f   :  { %654 = vperm.xlu1 %854, %v466_v29  }
  0x32   :  { %828 = vmatmul.mubr.msk.bf16.gmra.mrb[16].mxu0 %vm162_vm0, %v870_v13 }
  0x33   :  { %831 = vmatprep.mubr.msk.bf16.mxu0 %vm162_vm0, %v871_v14  ;;  %855 = vset.pattern.permute.xlu1 %v895_v36 }
  0x34   :  { %685 = vperm.xlu1 %855, %v682_v53  }
  0x3a   :  { %832 = vmatmul.mubr.msk.bf16.gmra.mrb[20].mxu0 %vm162_vm0, %v872_v15 }
  0x3b   :  { %835 = vmatprep.mubr.msk.bf16.mxu0 %vm162_vm0, %v873_v16 }
  0x42   :  { %836 = vmatmul.mubr.msk.bf16.gmra.mrb[24].mxu0 %vm162_vm0, %v874_v17 }
  0x43   :  { %839 = vmatprep.mubr.msk.bf16.mxu0 %vm162_vm0, %v875_v18 }
  0x4a   :  { %840 = vmatmul.mubr.msk.bf16.gmra.mrb[28].mxu0 %vm162_vm0, %v876_v19 }
  0xe5   :  { %v813_v31 = vpop.f32.mrb[0].mxu0 }
  0xe6   :  { %v374_v32 = vmul.f32 0.01, %v813_v31  ;;  %v245_v33 = vpop.f32.mrb[1].mxu0 }
  0xe7   :  { %v372_v34 = vmul.f32 0.01, %v245_v33  ;;  %v814_v35 = vpop.f32.mrb[2].mxu0 }
  0xe8   :  { %v375_v37 = vmul.f32 0.01, %v814_v35  ;;  %v248_v38 = vpop.f32.mrb[3].mxu0  ;;  %v406_v40 = vmax.f32 %v813_v31, %v374_v32 }
  0xe9   :  { %v373_v39 = vmul.f32 0.01, %v248_v38  ;;  %v404_v42 = vmax.f32 %v245_v33, %v372_v34 }
  0xea   :  { %v407_v41 = vmax.f32 %v814_v35, %v375_v37 }
  0xeb   :  { %v405_v43 = vmax.f32 %v248_v38, %v373_v39 }
  0xec   :  { %v1024_v44 = vpack.c.bf16 %v407_v41, %v406_v40 }
  0xed   :  { %v817_v45 = vpop.f32.mrb[4].mxu0  ;;  %v1026_v46 = vpack.c.bf16 %v405_v43, %v404_v42 }
  0xee   :  { %v378_v47 = vmul.f32 0.01, %v817_v45  ;;  %v261_v48 = vpop.f32.mrb[5].mxu0 }
  0xef   :  { %v376_v49 = vmul.f32 0.01, %v261_v48  ;;  %v818_v50 = vpop.f32.mrb[6].mxu0 }
  0xf0   :  { %v379_v51 = vmul.f32 0.01, %v818_v50  ;;  %v264_v52 = vpop.f32.mrb[7].mxu0  ;;  %v410_v55 = vmax.f32 %v817_v45, %v378_v47 }
  0xf1   :  { %v377_v54 = vmul.f32 0.01, %v264_v52  ;;  %v408_v57 = vmax.f32 %v261_v48, %v376_v49 }
  0xf2   :  { %v411_v56 = vmax.f32 %v818_v50, %v379_v51 }
  0xf3   :  { %v409_v58 = vmax.f32 %v264_v52, %v377_v54 }
  0xf4   :  { %v1031_v59 = vpack.c.bf16 %v411_v56, %v410_v55 }
  0xf5   :  { %v1033_v60 = vpack.c.bf16 %v409_v58, %v408_v57  ;;  %v821_v61 = vpop.f32.mrb[8].mxu0 }
  0xf6   :  { %v382_v62 = vmul.f32 0.01, %v821_v61  ;;  %v277_v63 = vpop.f32.mrb[9].mxu0 }
  0xf7   :  { %v380_v0 = vmul.f32 0.01, %v277_v63  ;;  %v822_v1 = vpop.f32.mrb[10].mxu0 }
  0xf8   :  { %v383_v2 = vmul.f32 0.01, %v822_v1  ;;  %v280_v3 = vpop.f32.mrb[11].mxu0  ;;  %v414_v5 = vmax.f32 %v821_v61, %v382_v62 }
  0xf9   :  { %v381_v4 = vmul.f32 0.01, %v280_v3  ;;  %v412_v7 = vmax.f32 %v277_v63, %v380_v0 }
  0xfa   :  { %v415_v6 = vmax.f32 %v822_v1, %v383_v2 }
  0xfb   :  { %v413_v8 = vmax.f32 %v280_v3, %v381_v4 }
  0xfc   :  { %v1035_v9 = vpack.c.bf16 %v415_v6, %v414_v5 }
  0xfd   :  { %v1037_v10 = vpack.c.bf16 %v413_v8, %v412_v7  ;;  %v825_v11 = vpop.f32.mrb[12].mxu0 }
  0xfe   :  { %v386_v12 = vmul.f32 0.01, %v825_v11  ;;  %v293_v13 = vpop.f32.mrb[13].mxu0 }
  0xff   :  { %v384_v14 = vmul.f32 0.01, %v293_v13  ;;  %v826_v15 = vpop.f32.mrb[14].mxu0 }
 0x100   :  { %v387_v16 = vmul.f32 0.01, %v826_v15  ;;  %v296_v17 = vpop.f32.mrb[15].mxu0  ;;  %v418_v19 = vmax.f32 %v825_v11, %v386_v12 }
 0x101   :  { %v385_v18 = vmul.f32 0.01, %v296_v17  ;;  %v416_v21 = vmax.f32 %v293_v13, %v384_v14 }
 0x102   :  { %v419_v20 = vmax.f32 %v826_v15, %v387_v16 }
 0x103   :  { %v417_v22 = vmax.f32 %v296_v17, %v385_v18 }
 0x104   :  { %v1039_v23 = vpack.c.bf16 %v419_v20, %v418_v19  ;;  %v877_v19 = vld [vmem:[%s1077_s2] ss:$8 sps:$4 sm:$0xff]   ;;  %v883_v20 = vld [vmem:[%s1077_s2 + $0x24] ss:$8 sps:$4 sm:$0xff]  }
 0x105   :  { %v1041_v24 = vpack.c.bf16 %v417_v22, %v416_v21  ;;  %v829_v25 = vpop.f32.mrb[16].mxu0  ;;  %v885_v21 = vld [vmem:[%s1077_s2 + $0x20] ss:$8 sps:$4 sm:$0xff]   ;;  %v886_v22 = vld [vmem:[%s1077_s2 + $0x34] ss:$8 sps:$4 sm:$0xff]  }
 0x106   :  { %v390_v26 = vmul.f32 0.01, %v829_v25  ;;  %v309_v27 = vpop.f32.mrb[17].mxu0 }
 0x107   :  { %v388_v28 = vmul.f32 0.01, %v309_v27  ;;  %v830_v29 = vpop.f32.mrb[18].mxu0 }
 0x108   :  { %v391_v30 = vmul.f32 0.01, %v830_v29  ;;  %v312_v31 = vpop.f32.mrb[19].mxu0  ;;  %v422_v33 = vmax.f32 %v829_v25, %v390_v26  ;;  %v635_v25 = vpop.permute.xlu0 %634 }
 0x109   :  { %v389_v32 = vmul.f32 0.01, %v312_v31  ;;  %v420_v35 = vmax.f32 %v309_v27, %v388_v28 }
 0x10a   :  { %v423_v34 = vmax.f32 %v830_v29, %v391_v30 }
 0x10b   :  { %v421_v36 = vmax.f32 %v312_v31, %v389_v32 }
 0x10c   :  { %v453_v37 = vpack.c.bf16 %v423_v34, %v422_v33  ;;  %v471_v27 = vpop.permute.xlu0 %470 }
 0x10d   :  { %v833_v38 = vpop.f32.mrb[20].mxu0  ;;  %v452_v39 = vpack.c.bf16 %v421_v36, %v420_v35 }
 0x10e   :  { %v394_v40 = vmul.f32 0.01, %v833_v38  ;;  %v325_v41 = vpop.f32.mrb[21].mxu0 }
 0x10f   :  { %v392_v42 = vmul.f32 0.01, %v325_v41  ;;  %v834_v43 = vpop.f32.mrb[22].mxu0  ;;  %763 = vmatprep.subr.bf16.mxu1 %v452_v39 }
 0x110   :  { %v395_v45 = vmul.f32 0.01, %v834_v43  ;;  %v328_v47 = vpop.f32.mrb[23].mxu0  ;;  %764 = vmatpush3.bf16.msra.mxu1 %v1026_v46  ;;  %v426_v49 = vmax.f32 %v833_v38, %v394_v40  ;;  %v476_v34 = vpop.permute.xlu0 %475 }
 0x111   :  { %v393_v48 = vmul.f32 0.01, %v328_v47  ;;  %765 = vmatprep.subr.bf16.mxu1 %v453_v37  ;;  %v424_v51 = vmax.f32 %v325_v41, %v392_v42 }
 0x112   :  { %v427_v50 = vmax.f32 %v834_v43, %v395_v45 }
 0x113   :  { %v425_v52 = vmax.f32 %v328_v47, %v393_v48 }
 0x114   :  { %v455_v53 = vpack.c.bf16 %v427_v50, %v426_v49  ;;  %766 = vmatpush3.bf16.msra.mxu1 %v1024_v44 }
 0x115   :  { %v454_v54 = vpack.c.bf16 %v425_v52, %v424_v51  ;;  %v837_v55 = vpop.f32.mrb[24].mxu0 }
 0x116   :  { %v398_v56 = vmul.f32 0.01, %v837_v55  ;;  %v341_v57 = vpop.f32.mrb[25].mxu0 }
 0x117   :  { %v396_v58 = vmul.f32 0.01, %v341_v57  ;;  %v838_v61 = vpop.f32.mrb[26].mxu0  ;;  %767 = vmatprep.subr.bf16.mxu1 %v454_v54 }
 0x118   :  { %v399_v62 = vmul.f32 0.01, %v838_v61  ;;  %v344_v63 = vpop.f32.mrb[27].mxu0  ;;  %768 = vmatpush3.bf16.msra.mxu1 %v1033_v60  ;;  %v430_v0 = vmax.f32 %v837_v55, %v398_v56  ;;  %v491_v55 = vpop.permute.xlu0 %490 }
 0x119   :  { %v397_v46 = vmul.f32 0.01, %v344_v63  ;;  %769 = vmatprep.subr.bf16.mxu1 %v455_v53  ;;  %v428_v2 = vmax.f32 %v341_v57, %v396_v58 }
 0x11a   :  { %v431_v1 = vmax.f32 %v838_v61, %v399_v62 }
 0x11b   :  { %v429_v3 = vmax.f32 %v344_v63, %v397_v46 }
 0x11c   :  { %v457_v4 = vpack.c.bf16 %v431_v1, %v430_v0  ;;  %770 = vmatpush3.bf16.msra.mxu1 %v1031_v59 }
 0x11d   :  { %v456_v44 = vpack.c.bf16 %v429_v3, %v428_v2  ;;  %v841_v5 = vpop.f32.mrb[28].mxu0 }
 0x11e   :  { %v402_v6 = vmul.f32 0.01, %v841_v5  ;;  %v357_v7 = vpop.f32.mrb[29].mxu0 }
 0x11f   :  { %v400_v8 = vmul.f32 0.01, %v357_v7  ;;  %v842_v11 = vpop.f32.mrb[30].mxu0  ;;  %771 = vmatprep.subr.bf16.mxu1 %v456_v44  ;;  %v501_v44 = vpop.permute.xlu0 %500 }
 0x120   :  { %v403_v12 = vmul.f32 0.01, %v842_v11  ;;  %v360_v13 = vpop.f32.mrb[31].mxu0  ;;  %772 = vmatpush3.bf16.msra.mxu1 %v1037_v10  ;;  %v434_v14 = vmax.f32 %v841_v5, %v402_v6  ;;  %v880_v10 = vld [vmem:[%s1077_s2 + $0x14] ss:$8 sps:$4 sm:$0xff]  }
 0x121   :  { %v401_v60 = vmul.f32 0.01, %v360_v13  ;;  %773 = vmatprep.subr.bf16.mxu1 %v457_v4  ;;  %v432_v16 = vmax.f32 %v357_v7, %v400_v8 }
 0x122   :  { %v435_v15 = vmax.f32 %v842_v11, %v403_v12 }
 0x123   :  { %v433_v17 = vmax.f32 %v360_v13, %v401_v60 }
 0x124   :  { %v459_v18 = vpack.c.bf16 %v435_v15, %v434_v14  ;;  %774 = vmatpush3.bf16.msra.mxu1 %v1035_v9  ;;  %v882_v9 = vld [vmem:[%s1077_s2 + $0x10] ss:$8 sps:$4 sm:$0xff]   ;;  %v647_v15 = vpop.permute.xlu0 %646 }
 0x125   :  { %v458_v59 = vpack.c.bf16 %v433_v17, %v432_v16 }
 0x127   :  { %775 = vmatprep.subr.bf16.mxu1 %v458_v59 }
 0x128   :  { %776 = vmatpush3.bf16.msra.mxu1 %v1041_v24  ;;  %v481_v24 = vpop.permute.xlu1 %480 }
 0x129   :  { %777 = vmatprep.subr.bf16.mxu1 %v459_v18 }
 0x12c   :  { %778 = vmatpush3.bf16.msra.mxu1 %v1039_v23  ;;  %v888_v23 = vld [vmem:[%s1077_s2 + $0x30] ss:$8 sps:$4 sm:$0xff]   ;;  %v486_v26 = vpop.permute.xlu1 %485 }
 0x12f   :  { %581 = vmatmul.mubr.bf16.vlgmr.msra.gmra.mrb[0].mxu1 %v877_v19 }
 0x130   :  { %588 = vmatprep.mubr.bf16.mxu1 %v880_v10  ;;  %v631_v28 = vpop.permute.xlu1 %630 }
 0x134   :  { %v496_v37 = vpop.permute.xlu1 %495 }
 0x137   :  { %589 = vmatmul.mubr.bf16.gmra.mrb[4].mxu1 %v882_v9 }
 0x138   :  { %596 = vmatprep.mubr.bf16.mxu1 %v883_v20  ;;  %v639_v49 = vpop.permute.xlu1 %638 }
 0x13c   :  { %v643_v46 = vpop.permute.xlu1 %642 }
 0x13f   :  { %597 = vmatmul.mubr.bf16.gmra.mrb[8].mxu1 %v885_v21 }
 0x140   :  { %604 = vmatprep.mubr.bf16.mxu1 %v886_v22  ;;  %v506_v12 = vpop.permute.xlu1 %505 }
 0x144   :  { %v651_v21 = vpop.permute.xlu1 %650 }
 0x147   :  { %605 = vmatmul.mubr.bf16.gmra.mrb[12].mxu1 %v888_v23 }
 0x202   :  { %v779_v29 = vpop.f32.mrb[0].mxu1 }
 0x203   :  { %v780_v30 = vpop.f32.mrb[1].mxu1 }
 0x204   :  { %v781_v31 = vadd.f32 %v780_v30, %v779_v29  ;;  %v782_v32 = vpop.f32.mrb[2].mxu1 }
 0x205   :  { %v783_v33 = vpop.f32.mrb[3].mxu1 }
 0x206   :  { %v583_v35 = vadd.f32 %v781_v31, %v471_v27  ;;  %v784_v36 = vadd.f32 %v783_v33, %v782_v32  ;;  %v655_v32 = vpop.permute.xlu1 %654 }
 0x208   :  { %v613_v38 = vmul.f32 0.01, %v583_v35  ;;  %v586_v39 = vadd.f32 %v784_v36, %v476_v34 }
 0x20a   :  { %v621_v40 = vmax.f32 %v583_v35, %v613_v38  ;;  %v614_v41 = vmul.f32 0.01, %v586_v39  ;;  %v785_v42 = vpop.f32.mrb[4].mxu1  ;;  %v659_v35 = vpop.permute.xlu0 %658 }
 0x20b   :  { %v786_v43 = vpop.f32.mrb[5].mxu1 }
 0x20c   :  { %v622_v45 = vmax.f32 %v586_v39, %v614_v41  ;;  %v787_v47 = vadd.f32 %v786_v43, %v785_v42  ;;  %v788_v48 = vpop.f32.mrb[6].mxu1  ;;  %v661_v51 = vmul.f32 %v631_v28, %v621_v40 }
 0x20d   :  { %v789_v50 = vpop.f32.mrb[7].mxu1 }
 0x20e   :  { %v662_v52 = vmul.f32 %v635_v25, %v622_v45  ;;  %v591_v53 = vadd.f32 %v787_v47, %v481_v24  ;;  %v790_v54 = vadd.f32 %v789_v50, %v788_v48  ;;  %v686_v45 = vpop.permute.xlu1 %685 }
 0x210   :  { %v615_v56 = vmul.f32 0.01, %v591_v53  ;;  %v669_v57 = vadd.f32 %v662_v52, %v661_v51  ;;  %v594_v58 = vadd.f32 %v790_v54, %v486_v26 }
 0x212   :  { %v623_v61 = vmax.f32 %v591_v53, %v615_v56  ;;  %v616_v62 = vmul.f32 0.01, %v594_v58  ;;  %v791_v63 = vpop.f32.mrb[8].mxu1 }
 0x213   :  { %v792_v0 = vpop.f32.mrb[9].mxu1 }
 0x214   :  { %v663_v1 = vmul.f32 %v639_v49, %v623_v61  ;;  %v624_v2 = vmax.f32 %v594_v58, %v616_v62  ;;  %v793_v3 = vadd.f32 %v792_v0, %v791_v63  ;;  %v794_v4 = vpop.f32.mrb[10].mxu1 }
 0x215   :  { %v795_v5 = vpop.f32.mrb[11].mxu1 }
 0x216   :  { %v670_v6 = vadd.f32 %v669_v57, %v663_v1  ;;  %v664_v7 = vmul.f32 %v643_v46, %v624_v2  ;;  %v599_v8 = vadd.f32 %v793_v3, %v491_v55  ;;  %v796_v11 = vadd.f32 %v795_v5, %v794_v4 }
 0x218   :  { %v671_v13 = vadd.f32 %v670_v6, %v664_v7  ;;  %v602_v60 = vadd.f32 %v796_v11, %v496_v37  ;;  %v617_v14 = vmul.f32 0.01, %v599_v8 }
 0x21a   :  { %v797_v16 = vpop.f32.mrb[12].mxu1  ;;  %v625_v17 = vmax.f32 %v599_v8, %v617_v14  ;;  %v618_v18 = vmul.f32 0.01, %v602_v60 }
 0x21b   :  { %v798_v59 = vpop.f32.mrb[13].mxu1 }
 0x21c   :  { %v665_v19 = vmul.f32 %v647_v15, %v625_v17  ;;  %v626_v10 = vmax.f32 %v602_v60, %v618_v18  ;;  %v799_v9 = vadd.f32 %v798_v59, %v797_v16  ;;  %v800_v20 = vpop.f32.mrb[14].mxu1 }
 0x21d   :  { %v801_v22 = vpop.f32.mrb[15].mxu1 }
 0x21e   :  { %v672_v23 = vadd.f32 %v671_v13, %v665_v19  ;;  %v666_v24 = vmul.f32 %v651_v21, %v626_v10  ;;  %v607_v25 = vadd.f32 %v799_v9, %v501_v44  ;;  %v802_v26 = vadd.f32 %v801_v22, %v800_v20 }
 0x220   :  { %v673_v27 = vadd.f32 %v672_v23, %v666_v24  ;;  %v610_v28 = vadd.f32 %v802_v26, %v506_v12  ;;  %v619_v29 = vmul.f32 0.01, %v607_v25 }
 0x222   :  { %v620_v30 = vmul.f32 0.01, %v610_v28  ;;  %v627_v31 = vmax.f32 %v607_v25, %v619_v29 }
 0x224   :  { %v628_v33 = vmax.f32 %v610_v28, %v620_v30  ;;  %v667_v34 = vmul.f32 %v655_v32, %v627_v31 }
 0x226   :  { %v668_v36 = vmul.f32 %v659_v35, %v628_v33  ;;  %v674_v37 = vadd.f32 %v673_v27, %v667_v34 }
 0x228   :  { %v675_v38 = vadd.f32 %v674_v37, %v668_v36 }
 0x22a   :  { %v676_v39 = vrot.slane %v675_v38, 4 }
 0x22c   :  { %v677_v40 = vadd.f32 %v676_v39, %v675_v38 }
 0x22e   :  { %v678_v41 = vrot.slane %v677_v40, 2 }
 0x230   :  { %v679_v42 = vadd.f32 %v678_v41, %v677_v40 }
 0x232   :  { %v680_v43 = vrot.slane %v679_v42, 1 }
 0x234   :  { %v681_v47 = vadd.f32 %v680_v43, %v679_v42 }
 0x236   :  { %v688_v48 = vadd.f32 %v686_v45, %v681_v47 }
 0x238   :  { %v689_v49 = vsub.f32 0.0, %v688_v48 }
 0x23a   :  { %v690_v50 = vmul.f32 1.442695, %v689_v49 }
 0x23c   :  { %889 = vpow2.f32 %v690_v50 }
 0x246   :  { %v890_v51 = vpop.eup %889 }
 0x247   :  { %v692_v52 = vadd.f32 1.0, %v890_v51 }
 0x249   :  { %891 = vrcp.f32 %v692_v52 }
 0x253   :  { %v892_v53 = vpop.eup %891 }
 0x254   :  { %694 = vst [vmem:[%s1079_s4] sm:$0x1] %v892_v53 }

</bundles_post_ra>
